<compile_context>
chip_gen: v7x
topology: tpu7x:2x2x1
jax: 0.10.0
libtpu: 0.0.40
codegen_flags: <defaults>
</compile_context>

<pallas_src>
import jax
import jax.numpy as jnp
from jax.experimental import pallas as pl
from jax.experimental.pallas import tpu as pltpu

EPS = 1e-5


# -----------------------------------------------------------------------------
# Fused kernel: depth-L chain of  x = SiLU(W'_l @ LN_c(x) + b'_l) + x
# on a (C, T_HW) channel-first tile (C = sublanes, spatial = lanes).
# gamma/beta are already folded into W'/b' on the host.
# -----------------------------------------------------------------------------
def _mewb2_kernel(x_ref, w_ref, b_ref, o_ref):
    # x_ref block: (1, C, T) ; params: (L, C, C) / (L, C, 1), VMEM-resident.
    x = x_ref[0].astype(jnp.float32)                       # (C, T)
    num_layers = w_ref.shape[0]
    for l in range(num_layers):                            # static unroll (L small)
        # Single-pass LayerNorm statistics over the channel (sublane) axis.
        mean = jnp.mean(x, axis=0, keepdims=True)          # (1, T)
        msq = jnp.mean(x * x, axis=0, keepdims=True)       # (1, T)
        var = jnp.maximum(msq - mean * mean, 0.0)
        xn = (x - mean) * jax.lax.rsqrt(var + EPS)
        # 1x1 channel mix on the MXU (gamma folded into columns of W').
        y = jnp.dot(w_ref[l], xn, preferred_element_type=jnp.float32) + b_ref[l]
        # SiLU + fused residual add (this is the `attn(x) + x` of MEWB2).
        x = y * jax.nn.sigmoid(y) + x
    o_ref[0] = x.astype(o_ref.dtype)


def mewb2_forward(x, params, *, t_hw=None, io_dtype=None):
    """x: (N, C, H, W) -> (N, C, H, W).  Whole residual chain in one kernel.

    io_dtype: dtype of the activations at the HBM<->VMEM boundary (compute is
    always f32 inside the kernel).  Pass jnp.bfloat16 to halve HBM traffic.
    """
    N, C, H, W = x.shape
    HW = H * W
    L = params["w"].shape[0]
    if io_dtype is None:
        io_dtype = x.dtype

    # --- Host-side fold of the LayerNorm affine into the 1x1 mix (f32) -------
    #   W'_l = W_l * gamma_l^T   (scale contraction-dim columns)
    #   b'_l = W_l @ beta_l + bias_l
    gamma = params["gamma"].astype(jnp.float32)            # (L, C, 1)
    beta = params["beta"].astype(jnp.float32)              # (L, C, 1)
    w = params["w"].astype(jnp.float32)                    # (L, C, C)
    bias = params["bias"].astype(jnp.float32)              # (L, C, 1)
    w_f = w * jnp.swapaxes(gamma, 1, 2)                    # (L, C, C)
    b_f = jnp.einsum("loc,lci->loi", w, beta) + bias       # (L, C, 1)

    # --- Lane-dense spatial layout: pad HW up to a multiple of 128 -----------
    xf = x.reshape(N, C, HW).astype(io_dtype)              # contiguous reshape
    hw_pad = ((HW + 127) // 128) * 128
    if hw_pad != HW:
        xf = jnp.pad(xf, ((0, 0), (0, 0), (0, hw_pad - HW)))

    # --- Spatial tile: largest 128-multiple divisor of hw_pad, capped at 2048
    if t_hw is None:
        t_hw = min(hw_pad, 2048)
        while hw_pad % t_hw != 0:
            t_hw -= 128
        # Keep >= 2 total grid steps so both v7x TensorCores get work.
        if N * (hw_pad // t_hw) < 2 and t_hw % 256 == 0:
            t_hw //= 2
    assert hw_pad % t_hw == 0 and t_hw % 128 == 0

    out = pl.pallas_call(
        _mewb2_kernel,
        out_shape=jax.ShapeDtypeStruct((N, C, hw_pad), io_dtype),
        grid=(N, hw_pad // t_hw),
        in_specs=[
            pl.BlockSpec((1, C, t_hw), lambda n, j: (n, 0, j)),
            pl.BlockSpec((L, C, C), lambda n, j: (0, 0, 0)),
            pl.BlockSpec((L, C, 1), lambda n, j: (0, 0, 0)),
        ],
        out_specs=pl.BlockSpec((1, C, t_hw), lambda n, j: (n, 0, j)),
        compiler_params=pltpu.CompilerParams(
            dimension_semantics=("parallel", "parallel")),
    )(xf, w_f, b_f)

    if hw_pad != HW:
        out = out[:, :, :HW]
    return out.reshape(N, C, H, W).astype(x.dtype)


# -----------------------------------------------------------------------------
# Pure-JAX reference (two-pass LN, gamma/beta applied explicitly) — validates
# both the single-pass variance and the host-side gamma/beta fold.
# -----------------------------------------------------------------------------
def ref_forward(x, params):
    N, C, H, W = x.shape
    v = x.reshape(N, C, H * W).astype(jnp.float32)
    L = params["w"].shape[0]
    for l in range(L):
        mu = jnp.mean(v, axis=1, keepdims=True)
        var = jnp.mean((v - mu) ** 2, axis=1, keepdims=True)
        vn = (v - mu) * jax.lax.rsqrt(var + EPS)
        vn = vn * params["gamma"][l][None] + params["beta"][l][None]
        y = jnp.einsum("oc,ncm->nom", params["w"][l], vn,
                       preferred_element_type=jnp.float32) + params["bias"][l][None]
        v = y * jax.nn.sigmoid(y) + v
    return v.reshape(N, C, H, W).astype(x.dtype)


# -----------------------------------------------------------------------------
# Deterministic parameter init
# -----------------------------------------------------------------------------
def init_params(key, C, depth):
    kw, kb, kg, kbt = jax.random.split(key, 4)
    return dict(
        gamma=1.0 + 0.1 * jax.random.normal(kg, (depth, C, 1), jnp.float32),
        beta=0.05 * jax.random.normal(kbt, (depth, C, 1), jnp.float32),
        w=jax.random.normal(kw, (depth, C, C), jnp.float32) * 0.05,
        bias=jax.random.normal(kb, (depth, C, 1), jnp.float32) * 0.01,
    )


if __name__ == "__main__":
    dim, depth = 32, 2
    key = jax.random.PRNGKey(0)
    kx, kp, kx2 = jax.random.split(key, 3)
    params = init_params(kp, dim, depth)

    # 1) Main check: f32 I/O, HW a multiple of 128 (lane-dense, no padding).
    x = jax.random.normal(kx, (2, dim, 16, 16), jnp.float32)
    out = jax.block_until_ready(mewb2_forward(x, params))
    ref = jax.block_until_ready(ref_forward(x, params))
    assert out.shape == x.shape and out.dtype == x.dtype
    assert jnp.allclose(out, ref, atol=2e-4, rtol=2e-4), "mismatch vs reference (f32)"

    # 2) Padding path: HW = 144 (not a multiple of 128) gets padded and cropped.
    x2 = jax.random.normal(kx2, (2, dim, 12, 12), jnp.float32)
    out2 = jax.block_until_ready(mewb2_forward(x2, params))
    ref2 = jax.block_until_ready(ref_forward(x2, params))
    assert jnp.allclose(out2, ref2, atol=2e-4, rtol=2e-4), "mismatch vs reference (padded)"

    # 3) bf16 activation I/O (halved HBM traffic), f32 compute inside.
    out_bf16 = jax.block_until_ready(mewb2_forward(x, params, io_dtype=jnp.bfloat16))
    assert out_bf16.dtype == x.dtype
    assert jnp.allclose(out_bf16, ref, atol=5e-2, rtol=5e-2), "mismatch vs reference (bf16 I/O)"

    print("KERNEL_OK")
</pallas_src>

<mosaic_0001>
module attributes {stable_mosaic.version = 11 : i64} {
  func.func @_mewb2_kernel(%arg0: i32, %arg1: i32, %arg2: memref<1x32x256xf32, #tpu.memory_space<vmem>>, %arg3: memref<2x32x32xf32, #tpu.memory_space<vmem>>, %arg4: memref<2x32x1xf32, #tpu.memory_space<vmem>>, %arg5: memref<1x32x256xf32, #tpu.memory_space<vmem>>) attributes {dimension_semantics = [#tpu.dimension_semantics<parallel>, #tpu.dimension_semantics<parallel>], iteration_bounds = array<i64: 2, 1>, scalar_prefetch = 0 : i64, scratch_operands = 0 : i64, tpu.core_type = #tpu.core_type<tc>, window_params = [{transform_indices = @transform_0, window_bounds = array<i64: 1, 32, 256>}, {pipeline_mode = #tpu.pipeline_mode<synchronous>, transform_indices = @transform_1, window_bounds = array<i64: 2, 32, 32>}, {pipeline_mode = #tpu.pipeline_mode<synchronous>, transform_indices = @transform_2, window_bounds = array<i64: 2, 32, 1>}, {transform_indices = @transform_3, window_bounds = array<i64: 1, 32, 256>}]} {
    %c0 = arith.constant 0 : index
    %c0_0 = arith.constant 0 : index
    %c0_1 = arith.constant 0 : index
    %0 = vector.load %arg2[%c0, %c0_0, %c0_1] : memref<1x32x256xf32, #tpu.memory_space<vmem>>, vector<1x32x256xf32>
    %1 = vector.shape_cast %0 : vector<1x32x256xf32> to vector<32x256xf32>
    %cst = arith.constant dense<0.000000e+00> : vector<256xf32>
    %2 = vector.multi_reduction <add>, %1, %cst [0] : vector<32x256xf32> to vector<256xf32>
    %3 = vector.shape_cast %2 : vector<256xf32> to vector<1x256xf32>
    %cst_2 = arith.constant 3.200000e+01 : f32
    %4 = vector.broadcast %cst_2 : f32 to vector<1x256xf32>
    %5 = arith.divf %3, %4 : vector<1x256xf32>
    %6 = arith.mulf %1, %1 : vector<32x256xf32>
    %cst_3 = arith.constant dense<0.000000e+00> : vector<256xf32>
    %7 = vector.multi_reduction <add>, %6, %cst_3 [0] : vector<32x256xf32> to vector<256xf32>
    %8 = vector.shape_cast %7 : vector<256xf32> to vector<1x256xf32>
    %cst_4 = arith.constant 3.200000e+01 : f32
    %9 = vector.broadcast %cst_4 : f32 to vector<1x256xf32>
    %10 = arith.divf %8, %9 : vector<1x256xf32>
    %11 = arith.mulf %5, %5 : vector<1x256xf32>
    %12 = arith.subf %10, %11 : vector<1x256xf32>
    %cst_5 = arith.constant 0.000000e+00 : f32
    %13 = vector.broadcast %cst_5 : f32 to vector<1x256xf32>
    %14 = arith.maximumf %12, %13 : vector<1x256xf32>
    %15 = vector.broadcast %5 : vector<1x256xf32> to vector<32x256xf32>
    %16 = arith.subf %1, %15 : vector<32x256xf32>
    %cst_6 = arith.constant 9.99999974E-6 : f32
    %17 = vector.broadcast %cst_6 : f32 to vector<1x256xf32>
    %18 = arith.addf %14, %17 : vector<1x256xf32>
    %19 = math.rsqrt %18 : vector<1x256xf32>
    %20 = vector.broadcast %19 : vector<1x256xf32> to vector<32x256xf32>
    %21 = arith.mulf %16, %20 : vector<32x256xf32>
    %c0_7 = arith.constant 0 : index
    %c0_8 = arith.constant 0 : index
    %c0_9 = arith.constant 0 : index
    %22 = vector.load %arg3[%c0_7, %c0_8, %c0_9] : memref<2x32x32xf32, #tpu.memory_space<vmem>>, vector<1x32x32xf32>
    %23 = vector.shape_cast %22 : vector<1x32x32xf32> to vector<32x32xf32>
    %cst_10 = arith.constant dense<0.000000e+00> : vector<32x256xf32>
    %24 = tpu.matmul %23, %21, %cst_10 {dimension_numbers = #tpu.dot_dimension_numbers<[1], [0], [0], [1], [0, 0, 1, 1], [], []>} : vector<32x32xf32>, vector<32x256xf32>, vector<32x256xf32> -> vector<32x256xf32>
    %c0_11 = arith.constant 0 : index
    %c0_12 = arith.constant 0 : index
    %c0_13 = arith.constant 0 : index
    %25 = vector.load %arg4[%c0_11, %c0_12, %c0_13] : memref<2x32x1xf32, #tpu.memory_space<vmem>>, vector<1x32x1xf32>
    %26 = vector.shape_cast %25 : vector<1x32x1xf32> to vector<32x1xf32>
    %27 = vector.broadcast %26 : vector<32x1xf32> to vector<32x256xf32>
    %28 = arith.addf %24, %27 : vector<32x256xf32>
    %29 = arith.negf %28 : vector<32x256xf32>
    %30 = math.exp %29 : vector<32x256xf32>
    %cst_14 = arith.constant 1.000000e+00 : f32
    %31 = vector.broadcast %cst_14 : f32 to vector<32x256xf32>
    %32 = arith.addf %31, %30 : vector<32x256xf32>
    %33 = arith.divf %31, %32 : vector<32x256xf32>
    %34 = arith.mulf %28, %33 : vector<32x256xf32>
    %35 = arith.addf %34, %1 : vector<32x256xf32>
    %cst_15 = arith.constant dense<0.000000e+00> : vector<256xf32>
    %36 = vector.multi_reduction <add>, %35, %cst_15 [0] : vector<32x256xf32> to vector<256xf32>
    %37 = vector.shape_cast %36 : vector<256xf32> to vector<1x256xf32>
    %cst_16 = arith.constant 3.200000e+01 : f32
    %38 = vector.broadcast %cst_16 : f32 to vector<1x256xf32>
    %39 = arith.divf %37, %38 : vector<1x256xf32>
    %40 = arith.mulf %35, %35 : vector<32x256xf32>
    %cst_17 = arith.constant dense<0.000000e+00> : vector<256xf32>
    %41 = vector.multi_reduction <add>, %40, %cst_17 [0] : vector<32x256xf32> to vector<256xf32>
    %42 = vector.shape_cast %41 : vector<256xf32> to vector<1x256xf32>
    %cst_18 = arith.constant 3.200000e+01 : f32
    %43 = vector.broadcast %cst_18 : f32 to vector<1x256xf32>
    %44 = arith.divf %42, %43 : vector<1x256xf32>
    %45 = arith.mulf %39, %39 : vector<1x256xf32>
    %46 = arith.subf %44, %45 : vector<1x256xf32>
    %cst_19 = arith.constant 0.000000e+00 : f32
    %47 = vector.broadcast %cst_19 : f32 to vector<1x256xf32>
    %48 = arith.maximumf %46, %47 : vector<1x256xf32>
    %49 = vector.broadcast %39 : vector<1x256xf32> to vector<32x256xf32>
    %50 = arith.subf %35, %49 : vector<32x256xf32>
    %cst_20 = arith.constant 9.99999974E-6 : f32
    %51 = vector.broadcast %cst_20 : f32 to vector<1x256xf32>
    %52 = arith.addf %48, %51 : vector<1x256xf32>
    %53 = math.rsqrt %52 : vector<1x256xf32>
    %54 = vector.broadcast %53 : vector<1x256xf32> to vector<32x256xf32>
    %55 = arith.mulf %50, %54 : vector<32x256xf32>
    %c1 = arith.constant 1 : index
    %c0_21 = arith.constant 0 : index
    %c0_22 = arith.constant 0 : index
    %56 = vector.load %arg3[%c1, %c0_21, %c0_22] : memref<2x32x32xf32, #tpu.memory_space<vmem>>, vector<1x32x32xf32>
    %57 = vector.shape_cast %56 : vector<1x32x32xf32> to vector<32x32xf32>
    %cst_23 = arith.constant dense<0.000000e+00> : vector<32x256xf32>
    %58 = tpu.matmul %57, %55, %cst_23 {dimension_numbers = #tpu.dot_dimension_numbers<[1], [0], [0], [1], [0, 0, 1, 1], [], []>} : vector<32x32xf32>, vector<32x256xf32>, vector<32x256xf32> -> vector<32x256xf32>
    %c1_24 = arith.constant 1 : index
    %c0_25 = arith.constant 0 : index
    %c0_26 = arith.constant 0 : index
    %59 = vector.load %arg4[%c1_24, %c0_25, %c0_26] : memref<2x32x1xf32, #tpu.memory_space<vmem>>, vector<1x32x1xf32>
    %60 = vector.shape_cast %59 : vector<1x32x1xf32> to vector<32x1xf32>
    %61 = vector.broadcast %60 : vector<32x1xf32> to vector<32x256xf32>
    %62 = arith.addf %58, %61 : vector<32x256xf32>
    %63 = arith.negf %62 : vector<32x256xf32>
    %64 = math.exp %63 : vector<32x256xf32>
    %cst_27 = arith.constant 1.000000e+00 : f32
    %65 = vector.broadcast %cst_27 : f32 to vector<32x256xf32>
    %66 = arith.addf %65, %64 : vector<32x256xf32>
    %67 = arith.divf %65, %66 : vector<32x256xf32>
    %68 = arith.mulf %62, %67 : vector<32x256xf32>
    %69 = arith.addf %68, %35 : vector<32x256xf32>
    %c0_28 = arith.constant 0 : index
    %c0_29 = arith.constant 0 : index
    %c0_30 = arith.constant 0 : index
    %70 = vector.load %arg5[%c0_28, %c0_29, %c0_30] : memref<1x32x256xf32, #tpu.memory_space<vmem>>, vector<1x32x256xf32>
    %71 = vector.shape_cast %70 : vector<1x32x256xf32> to vector<32x256xf32>
    %72 = vector.shape_cast %69 : vector<32x256xf32> to vector<1x32x256xf32>
    tpu.vector_store %arg5[%c0_28, %c0_29, %c0_30], %72 {strides = array<i32>} : memref<1x32x256xf32, #tpu.memory_space<vmem>>, vector<1x32x256xf32>,
    return
  }
  func.func @transform_0(%arg0: i32, %arg1: i32) -> (i32, i32, i32) {
    %c0_i32 = arith.constant 0 : i32
    %c0_i32_0 = arith.constant 0 : i32
    return %arg0, %c0_i32, %arg1 : i32, i32, i32
  }
  func.func @transform_1(%arg0: i32, %arg1: i32) -> (i32, i32, i32) {
    %c0_i32 = arith.constant 0 : i32
    %c0_i32_0 = arith.constant 0 : i32
    %c0_i32_1 = arith.constant 0 : i32
    %c0_i32_2 = arith.constant 0 : i32
    return %c0_i32, %c0_i32_0, %c0_i32_1 : i32, i32, i32
  }
  func.func @transform_2(%arg0: i32, %arg1: i32) -> (i32, i32, i32) {
    %c0_i32 = arith.constant 0 : i32
    %c0_i32_0 = arith.constant 0 : i32
    %c0_i32_1 = arith.constant 0 : i32
    %c0_i32_2 = arith.constant 0 : i32
    return %c0_i32, %c0_i32_0, %c0_i32_1 : i32, i32, i32
  }
  func.func @transform_3(%arg0: i32, %arg1: i32) -> (i32, i32, i32) {
    %c0_i32 = arith.constant 0 : i32
    %c0_i32_0 = arith.constant 0 : i32
    return %arg0, %c0_i32, %arg1 : i32, i32, i32
  }
}

</mosaic_0001>

<bundles_post_ra>
// kernel: tpu_custom_call.1
= control target key start
LH: loop header
LB: loop body
LE: loop exit
PB: predicated region body
PF: predicated region fallthrough
CT: control target
= control target key end

     0   :  { %8 = vsyncpa [#allocation3], 0  ;;  %s1574_s0 = inlined_call_operand.hbm [shape: f32[2,32,256], index: 0, kind: input, shape index: {}]   ;;  %s1575_s1 = inlined_call_operand.vmem [shape: f32[2,32,32], index: 1, kind: input, shape index: {}]   ;;  %s1576_s2 = inlined_call_operand.vmem [shape: f32[2,32,1], index: 2, kind: input, shape index: {}]   ;;  %s1577_s3 = inlined_call_operand.hbm [shape: f32[2,32,256], index: 3, kind: output, shape index: {}]  }
   0x1   :  { %10 = vsyncpa [#allocation3 + $0x1], 0 }
   0x2   :  { %11 = vsyncpa [#allocation4], 0 }
   0x3   :  { %13 = vsyncpa [#allocation4 + $0x1], 0  ;;  %s1215_s12 = smov 0   ;;  %s1217_s13 = smov 0  }
   0x4   :  { %s1219_s14 = smov 0   ;;  %s1221_s15 = smov 0  }
   0x5   :  { %s1223_s16 = smov 0   ;;  %s1225_s17 = smov 0  }
   0x6 LB: > { %s866_s18 = sadd.s32 4294967295, %s1185_s17   ;;  %s867_s19 = sadd.s32 4294967294, %s1185_s17   ;;  %s1185_s17 = sphi %s1225_s17, %s19_s17   ;;  %s1181_s16 = sphi %s1223_s16, %s1592_s16   ;;  %s1177_s15 = sphi %s1221_s15, %s1591_s15   ;;  %s1173_s14 = sphi %s1219_s14, %s1590_s14   ;;  %s1169_s13 = sphi %s1217_s13, %s1589_s13   ;;  %s1165_s12 = sphi %s1215_s12, %s1588_s12  }
   0x7   : > { %s31_s20 = sadd.s32 1, %s1181_s16  ;;  %s40_s21 = sadd.s32 1, %s1173_s14 }
   0x8   : > { %p33_p0 = scmp.ge.s32.totalorder %s31_s20, 2  ;;  %p47_p1 = scmp.ne.s32.totalorder %s1173_s14, %s1169_s13 }
   0x9   : > { %p48_p2 = scmp.eq.s32.totalorder %s1185_s17, 0  ;;  %p53_p3 = scmp.ne.s32.totalorder %s1169_s13, %s1165_s12 }
   0xa   : > { %s1594_s20 = smov (%p33_p0, %s31_s20), 0  ;;  %p54_p5 = scmp.eq.s32.totalorder %s866_s18, 0 }
   0xb   : > { %p1256_p4 = por %p48_p2, %p47_p1  ;;  %s35_s23 = ssub.s32 %s1181_s16, %s1594_s20 }
   0xc   : > { %p121_p6 = scmp.eq.s32.totalorder %s866_s18, 1  ;;  %p38_p7 = scmp.eq.s32.totalorder %s35_s23, 0 }
   0xd   : > { %p1262_p8 = por %p54_p5, %p53_p3  ;;  %p127_p10 = scmp.eq.s32.totalorder %s867_s19, 1 }
   0xe   : > { %p1266_p9 = por %p121_p6, %p47_p1  ;;  %p943_p13 = scmp.lt.s32.totalorder %s1185_s17, 2 }
   0xf   : > { %s1271_s26 = scalar_select %p38_p7, %s1173_s14, %s40_s21  }
  0x10   : > { %s1581_s25 = scalar_select %p1266_p9, 1, 0 }
  0x11   : > { %p1273_p11 = por %p127_p10, %p53_p3  ;;  %s153_s28 = sand.u32 1, %s1173_s14  }
  0x12   : > { %s870_s29 = sshll.u32 %s153_s28, 6  ;;  %s913_s30 = sshll.u32 %s1181_s16, 10 }
  0x13   : > { %s1582_s27 = scalar_select %p1273_p11, 1, 0 }
  0x14   : > { %s1284_s6 = scalar_lea.hbm %s1574_s0, %s913_s30  ;;  %s157_s7 = scalar_lea.vmem [#allocation2], %s870_s29 }
  0x15   : > { %s166_s8 = sshll.u32 %s157_s7, 4  ;;  %p1290_p0 = pnand %p943_p13, %p1256_p4  ;;  %s1286_s8 = int_to_ptr.vmem [resolvable:$true] %s166_s8 }
  0x16   : > { %s1295_s10 = scalar_lea.sflag [#allocation3], %s153_s28  ;;  %s1073_s11 = scalar_lea.hbm %s1284_s6, 1024 }
  0x17   : > { %p1074_p2 = scmp.ne.s32.totalorder %s1284_s6, %s1073_s11  ;;  %p1075_p3 = pneg %p1290_p0 }
  0x18   : > { %s1078_s21 = scalar_lea.hbm %s1574_s0, 2048  ;;  %p1079_p4 = scmp.lt.u32.totalorder %s1284_s6, %s1574_s0 }
  0x19   : > { %p1076_p5 = pnand %p1075_p3, %p1074_p2  ;;  %p1080_p7 = scmp.lt.u32.totalorder %s1078_s21, %s1073_s11 }
  0x1a   : > { %p1082_p13 = scmp.lt.u32.totalorder %s1073_s11, %s1284_s6 }
  0x1b   : > { %p1077_p6 = pneg %p1076_p5  ;;  %p1081_p10 = por %p1080_p7, %p1079_p4 }
  0x1d   : > { %p1083_p12 = por %p1082_p13, %p1081_p10 }
  0x1f   : > { %p1084_p1 = pnand %p1083_p12, %p1077_p6 }
  0x21   : > { %1087 = shalt.err (!%p1084_p1)
}
  0x22   : > { %s1088_s28 = scalar_lea.vmem %s1286_s8, 1024  ;;  %s1187_s29 = smov [#allocation2]  }
  0x23   : > { %p1089_p2 = scmp.ne.s32.totalorder %s1286_s8, %s1088_s28  ;;  %s1093_s30 = sshll.u32 %s1187_s29, 4  ;;  %s1094_s30 = int_to_ptr.vmem [resolvable:$false] %s1093_s30 }
  0x24   : > { %s1095_s4 = scalar_lea.vmem %s1094_s30, 2048  ;;  %p1096_p9 = scmp.lt.s32.totalorder %s1286_s8, %s1094_s30 }
  0x25   : > { %p1091_p5 = pnand %p1089_p2, %p1075_p3  ;;  %p1097_p4 = scmp.lt.s32.totalorder %s1095_s4, %s1088_s28 }
  0x27   : > { %p1092_p11 = pneg %p1091_p5  ;;  %p1098_p7 = por %p1097_p4, %p1096_p9 }
  0x29   : > { %p1099_p10 = pnand %p1098_p7, %p1092_p11 }
  0x2b   : > { %1102 = shalt.err (!%p1099_p10)
}
  0x2c   : > { %s1188_s5 = smov 256   ;;  %s1189_s7 = smov 16  }
  0x2d   : > { %938 = dma.hbm_to_vmem [thread:$0]  (!%p1290_p0), %s1284_s6, 1024, %s1286_s8, %s1295_s10, %s1188_s5, %s1188_s5, %s1189_s7  }
  0x2e   : > { %p174_p12 = scmp.lt.s32.totalorder %s1185_s17, 3  ;;  %p1584_p1 = scmp.ge.s32.totalorder %s1185_s17, 1 }
  0x30   : > { %p175_p3 = pnand %p1584_p1, %p174_p12 }
  0x31   : > { %s1327_s11 = sand.u32 (!%p175_p3), 1, %s1169_s13  }
  0x32   : > { %178 = sbr.rel (%p175_p3) target bundleno = 690 (0x2b2), region = 32  ;;  %s874_s18 = sshll.u32 (!%p175_p3), %s1327_s11, 6 }
  0x33   : > { %s181_s19 = scalar_lea.sflag (!%p175_p3), [#allocation3], %s1327_s11  ;;  %s184_s21 = scalar_lea.vmem (!%p175_p3), [#allocation2], %s874_s18 }
  0x39   : > { %1156 = dma.done.wait (%p1262_p8), %s181_s19, 1024  }
  0x3a   : > { %1158 = vsyncadd (%p1262_p8), %s181_s19, 4294966272  ;;  %v1190_v0 = vmov 0.0   ;;  %v1191_v1 = vmov 0   ;;  %v1339_v2 = vld [vmem:[%s184_s21 + $0x8] sm:$0xff]  ;;  %v1341_v3 = vld [vmem:[%s184_s21 + $0x18] sm:$0xff]  ;;  %vm320_vm0 = vcmask 261120  }
  0x3b   : > { %397 = vmatprep.mubr.f32.mxu0 %v1190_v0  ;;  %999 = vset.pattern.permute.xlu0 %v1191_v1  ;;  %v1343_v4 = vld [vmem:[%s184_s21 + $0x28] sm:$0xff]  ;;  %v1345_v5 = vld [vmem:[%s184_s21 + $0x38] sm:$0xff]  ;;  %v226_v6 = vadd.f32 %v1341_v3, %v1339_v2  ;;  %v239_v7 = vmul.f32 %v1339_v2, %v1339_v2  ;;  %v241_v8 = vmul.f32 %v1341_v3, %v1341_v3  ;;  %v1355_v10 = vld [vmem:[%s184_s21] sm:$0xff]  ;;  %s206_s8 = scalar_lea.vmem [#allocation5], %s874_s18  ;;  %s914_s18 = sshll.u32 %s1177_s15, 10 }
  0x3c   : > { %1000 = vset.pattern.permute.xlu1 %v1191_v1  ;;  %666 = vmatprep.mubr.f32.mxu1 %v1190_v0  ;;  %v243_v9 = vmul.f32 %v1343_v4, %v1343_v4  ;;  %v1357_v11 = vld [vmem:[%s184_s21 + $0x10] sm:$0xff]  ;;  %v1359_v12 = vld [vmem:[%s184_s21 + $0x20] sm:$0xff]  ;;  %v238_v15 = vmul.f32 %v1355_v10, %v1355_v10  ;;  %v245_v18 = vmul.f32 %v1345_v5, %v1345_v5  ;;  %v297_v30 = vld [vmem:[%s1576_s2 + $0x8] sm:$0xff]  ;;  %s779_s9 = sshll.u32 %s206_s8, 4  ;;  %s1522_s23 = scalar_lea.hbm %s1577_s3, %s914_s18  ;;  %s1524_s9 = int_to_ptr.vmem [resolvable:$true] %s779_s9 }
  0x3d   : > { %v1361_v13 = vld [vmem:[%s184_s21 + $0x30] sm:$0xff]  ;;  %v217_v14 = vadd.f32 %v1357_v11, %v1355_v10  ;;  %v240_v16 = vmul.f32 %v1357_v11, %v1357_v11  ;;  %v227_v17 = vadd.f32 %v226_v6, %v1343_v4  ;;  %v255_v19 = vadd.f32 %v241_v8, %v239_v7  ;;  %v296_v24 = vld [vmem:[%s1576_s2] sm:$0xff]  ;;  %v299_v31 = vld [vmem:[%s1576_s2 + $0x18] sm:$0xff]  ;;  %s764_s15 = scalar_lea.sflag [#allocation4], %s1327_s11  ;;  %s1103_s28 = scalar_lea.vmem %s1524_s9, 1024 }
  0x3e   : > { %v242_v20 = vmul.f32 %v1359_v12, %v1359_v12  ;;  %v244_v22 = vmul.f32 %v1361_v13, %v1361_v13  ;;  %v298_v25 = vld [vmem:[%s1576_s2 + $0x10] sm:$0xff]  ;;  %302 = vperm.xlu0 %999, %v296_v24   ;;  %v892_v40 = vld [vmem:[%s1576_s2 + $0x20] sm:$0xff]  ;;  %v893_v41 = vld [vmem:[%s1576_s2 + $0x28] sm:$0xff]  ;;  %p1104_p8 = scmp.ne.s32.totalorder %s1524_s9, %s1103_s28  ;;  %p1585_p9 = scmp.ne.s32.totalorder %s1581_s25, 0 }
  0x3f   : > { %v218_v21 = vadd.f32 %v217_v14, %v1359_v12  ;;  %v246_v23 = vadd.f32 %v240_v16, %v238_v15  ;;  %v228_v26 = vadd.f32 %v227_v17, %v1345_v5  ;;  %v256_v27 = vadd.f32 %v255_v19, %v243_v9  ;;  %312 = vperm.xlu1 %1000, %v298_v25   ;;  %v894_v50 = vld [vmem:[%s1576_s2 + $0x30] sm:$0xff]  ;;  %v895_v51 = vld [vmem:[%s1576_s2 + $0x38] sm:$0xff]  ;;  %s1192_s29 = smov [#allocation5]  }
  0x40   : > { %p1105_p11 = pnand %p1104_p8, %p1585_p9  ;;  %s1107_s30 = sshll.u32 %s1192_s29, 4  ;;  %s1108_s30 = int_to_ptr.vmem [resolvable:$false] %s1107_s30 }
  0x41   : > { %v219_v28 = vadd.f32 %v218_v21, %v1361_v13  ;;  %v247_v29 = vadd.f32 %v246_v23, %v242_v20  ;;  %v229_v32 = vrot.slane %v228_v26, 4  ;;  %v257_v33 = vadd.f32 %v256_v27, %v245_v18  ;;  %s1109_s4 = scalar_lea.vmem %s1108_s30, 2048  ;;  %p1110_p6 = scmp.lt.s32.totalorder %s1524_s9, %s1108_s30 }
  0x42   : > { %307 = vperm.xlu0 %999, %v297_v30   ;;  %p1106_p0 = pneg %p1105_p11  ;;  %p1111_p13 = scmp.lt.s32.totalorder %s1109_s4, %s1103_s28 }
  0x43   : > { %v220_v34 = vrot.slane %v219_v28, 4  ;;  %v248_v35 = vadd.f32 %v247_v29, %v244_v22  ;;  %v230_v36 = vadd.f32 %v229_v32, %v228_v26  ;;  %v258_v37 = vrot.slane %v257_v33, 4  ;;  %317 = vperm.xlu1 %1000, %v299_v31  }
  0x44   : > { %p1112_p2 = por %p1111_p13, %p1110_p6 }
  0x45   : > { %v221_v38 = vadd.f32 %v220_v34, %v219_v28  ;;  %v249_v39 = vrot.slane %v248_v35, 4  ;;  %v231_v42 = vrot.slane %v230_v36, 2  ;;  %v259_v43 = vadd.f32 %v258_v37, %v257_v33 }
  0x46   : > { %572 = vperm.xlu0 %999, %v892_v40   ;;  %p1113_p5 = pnand %p1112_p2, %p1106_p0 }
  0x47   : > { %v222_v44 = vrot.slane %v221_v38, 2  ;;  %v250_v45 = vadd.f32 %v249_v39, %v248_v35  ;;  %v232_v46 = vadd.f32 %v231_v42, %v230_v36  ;;  %v260_v47 = vrot.slane %v259_v43, 2  ;;  %577 = vperm.xlu1 %1000, %v893_v41   ;;  %v292_v41 = vld [vmem:[%s1575_s1] sm:$0xff]  ;;  %v293_v42 = vld [vmem:[%s1575_s1 + $0x8] sm:$0xff] }
  0x49   : > { %v223_v48 = vadd.f32 %v222_v44, %v221_v38  ;;  %v251_v49 = vrot.slane %v250_v45, 2  ;;  %v233_v52 = vrot.slane %v232_v46, 1  ;;  %v261_v53 = vadd.f32 %v260_v47, %v259_v43  ;;  %v294_v43 = vld [vmem:[%s1575_s1 + $0x10] sm:$0xff]  ;;  %v295_v44 = vld [vmem:[%s1575_s1 + $0x18] sm:$0xff] }
  0x4a   : > { %582 = vperm.xlu0 %999, %v894_v50  }
  0x4b   : > { %v224_v54 = vrot.slane %v223_v48, 1  ;;  %v252_v55 = vadd.f32 %v251_v49, %v250_v45  ;;  %v234_v56 = vadd.f32 %v233_v52, %v232_v46  ;;  %v262_v57 = vrot.slane %v261_v53, 1  ;;  %587 = vperm.xlu1 %1000, %v895_v51  }
  0x4d   : > { %v225_v58 = vadd.f32 %v224_v54, %v223_v48  ;;  %v253_v59 = vrot.slane %v252_v55, 1  ;;  %v237_v60 = vmul.f32 0.03125, %v234_v56  ;;  %v263_v61 = vadd.f32 %v262_v57, %v261_v53 }
  0x4f   : > { %v236_v62 = vmul.f32 0.03125, %v225_v58  ;;  %v254_v63 = vadd.f32 %v253_v59, %v252_v55  ;;  %v265_v1 = vmul.f32 0.03125, %v263_v61  ;;  %v267_v6 = vmul.f32 %v237_v60, %v237_v60 }
  0x50   : > { %v273_v19 = vsub.f32 %v1339_v2, %v237_v60  ;;  %v275_v20 = vsub.f32 %v1341_v3, %v237_v60  ;;  %v277_v21 = vsub.f32 %v1343_v4, %v237_v60  ;;  %v279_v22 = vsub.f32 %v1345_v5, %v237_v60 }
  0x51   : > { %v264_v7 = vmul.f32 0.03125, %v254_v63  ;;  %v266_v8 = vmul.f32 %v236_v62, %v236_v62  ;;  %v269_v9 = vsub.f32 %v265_v1, %v267_v6  ;;  %v272_v23 = vsub.f32 %v1355_v10, %v236_v62 }
  0x52   : > { %v274_v24 = vsub.f32 %v1357_v11, %v236_v62  ;;  %v276_v25 = vsub.f32 %v1359_v12, %v236_v62  ;;  %v278_v26 = vsub.f32 %v1361_v13, %v236_v62 }
  0x53   : > { %v268_v14 = vsub.f32 %v264_v7, %v266_v8  ;;  %v271_v15 = vmax.f32 %v269_v9, 0.0 }
  0x55   : > { %v270_v16 = vmax.f32 %v268_v14, 0.0  ;;  %v281_v17 = vadd.f32 1e-05, %v271_v15 }
  0x57   : > { %v280_v18 = vadd.f32 1e-05, %v270_v16  ;;  %1001 = vrsqrt.f32 %v281_v17 }
  0x59   : > { %1003 = vrsqrt.f32 %v280_v18 }
  0x61   : > { %v1002_v27 = vpop.eup %1001 }
  0x62   : > { %v285_v29 = vmul.f32 %v1002_v27, %v273_v19  ;;  %v287_v30 = vmul.f32 %v1002_v27, %v275_v20  ;;  %v289_v31 = vmul.f32 %v1002_v27, %v277_v21  ;;  %v291_v32 = vmul.f32 %v1002_v27, %v279_v22 }
  0x63   : > { %v1004_v28 = vpop.eup %1003 }
  0x64   : > { %v284_v33 = vmul.f32 %v1004_v28, %v272_v23  ;;  %v286_v34 = vmul.f32 %v1004_v28, %v274_v24  ;;  %v288_v35 = vmul.f32 %v1004_v28, %v276_v25  ;;  %v290_v36 = vmul.f32 %v1004_v28, %v278_v26 }
  0x65   : > { %v915_v37 = vpack.c.bf16 %v287_v30, %v285_v29  ;;  %v919_v38 = vpack.c.bf16 %v291_v32, %v289_v31 }
  0x66   : > { %v917_v39 = vpack.c.bf16 %v286_v34, %v284_v33  ;;  %v921_v40 = vpack.c.bf16 %v290_v36, %v288_v35 }
  0x67   : > { %916 = vmatprep.subr.bf16.mxu0 %v915_v37 }
  0x68   : > { %918 = vmatpush1.bf16.msra.mxu0 %v917_v39 }
  0x69   : > { %920 = vmatprep.subr.bf16.mxu0 %v919_v38 }
  0x6c   : > { %922 = vmatpush1.bf16.msra.mxu0 %v921_v40 }
  0x6f   : > { %876 = vmatmul.mubr.msk.f32.vlgmr.msra.gmra.mrb[0].mxu0 %vm320_vm0, %v292_v41 }
  0x70   : > { %403 = vmatprep.mubr.f32.mxu0 %v1190_v0 }
  0x73   : > { %877 = vmatmul.mubr.msk.f32.gmra.mrb[2].mxu0 %vm320_vm0, %v293_v42 }
  0x74   : > { %409 = vmatprep.mubr.f32.mxu0 %v1190_v0 }
  0x77   : > { %878 = vmatmul.mubr.msk.f32.gmra.mrb[4].mxu0 %vm320_vm0, %v294_v43 }
  0x78   : > { %415 = vmatprep.mubr.f32.mxu0 %v1190_v0 }
  0x7b   : > { %879 = vmatmul.mubr.msk.f32.gmra.mrb[6].mxu0 %vm320_vm0, %v295_v44 }
  0xbd   : > { %v303_v45 = vpop.permute.xlu0 %302 }
  0xbe   : > { %v313_v56 = vpop.permute.xlu1 %312 }
  0xc1   : > { %v308_v51 = vpop.permute.xlu0 %307 }
  0xc2   : > { %v318_v6 = vpop.permute.xlu1 %317 }
 0x142   : > { %v399_v46 = vpop.f32.mrb[0].mxu0 }
 0x143   : > { %v400_v47 = vadd.f32 %v399_v46, %v303_v45  ;;  %v401_v48 = vpop.f32.mrb[1].mxu0 }
 0x144   : > { %v1430_v49 = vadd.f32 %v401_v48, %v303_v45 }
 0x145   : > { %v880_v50 = vmul.f32 -1.442695, %v400_v47 }
 0x146   : > { %v881_v52 = vmul.f32 -1.442695, %v1430_v49  ;;  %v405_v53 = vpop.f32.mrb[2].mxu0 }
 0x147   : > { %1005 = vpow2.f32 %v880_v50  ;;  %v406_v54 = vadd.f32 %v405_v53, %v308_v51  ;;  %v407_v55 = vpop.f32.mrb[3].mxu0 }
 0x148   : > { %1007 = vpow2.f32 %v881_v52  ;;  %v408_v57 = vadd.f32 %v407_v55, %v308_v51 }
 0x149   : > { %v882_v58 = vmul.f32 -1.442695, %v406_v54 }
 0x14a   : > { %v883_v59 = vmul.f32 -1.442695, %v408_v57  ;;  %v411_v60 = vpop.f32.mrb[4].mxu0 }
 0x14b   : > { %1009 = vpow2.f32 %v882_v58  ;;  %v412_v61 = vadd.f32 %v411_v60, %v313_v56  ;;  %v413_v62 = vpop.f32.mrb[5].mxu0 }
 0x14c   : > { %1011 = vpow2.f32 %v883_v59  ;;  %v414_v63 = vadd.f32 %v413_v62, %v313_v56 }
 0x14d   : > { %v884_v1 = vmul.f32 -1.442695, %v412_v61 }
 0x14e   : > { %v885_v7 = vmul.f32 -1.442695, %v414_v63  ;;  %v417_v8 = vpop.f32.mrb[6].mxu0 }
 0x14f   : > { %1013 = vpow2.f32 %v884_v1  ;;  %v418_v9 = vadd.f32 %v417_v8, %v318_v6  ;;  %v419_v14 = vpop.f32.mrb[7].mxu0 }
 0x150   : > { %1015 = vpow2.f32 %v885_v7  ;;  %v420_v15 = vadd.f32 %v419_v14, %v318_v6 }
 0x151   : > { %v1006_v16 = vpop.eup %1005  ;;  %v886_v17 = vmul.f32 -1.442695, %v418_v9 }
 0x152   : > { %v1008_v18 = vpop.eup %1007  ;;  %v446_v19 = vadd.f32 1.0, %v1006_v16  ;;  %v887_v20 = vmul.f32 -1.442695, %v420_v15 }
 0x153   : > { %v447_v21 = vadd.f32 1.0, %v1008_v18  ;;  %1017 = vpow2.f32 %v886_v17 }
 0x154   : > { %1019 = vrcp.f32 %v446_v19 }
 0x155   : > { %v1010_v22 = vpop.eup %1009  ;;  %1021 = vpow2.f32 %v887_v20 }
 0x156   : > { %v1012_v23 = vpop.eup %1011  ;;  %v448_v24 = vadd.f32 1.0, %v1010_v22  ;;  %1023 = vrcp.f32 %v447_v21 }
 0x157   : > { %v449_v25 = vadd.f32 1.0, %v1012_v23 }
 0x158   : > { %1025 = vrcp.f32 %v448_v24 }
 0x159   : > { %v1014_v26 = vpop.eup %1013  ;;  %1027 = vrcp.f32 %v449_v25 }
 0x15a   : > { %v1016_v27 = vpop.eup %1015  ;;  %v450_v28 = vadd.f32 1.0, %v1014_v26 }
 0x15b   : > { %v451_v29 = vadd.f32 1.0, %v1016_v27 }
 0x15c   : > { %1029 = vrcp.f32 %v450_v28 }
 0x15d   : > { %v1018_v30 = vpop.eup %1017  ;;  %1031 = vrcp.f32 %v451_v29 }
 0x15e   : > { %v452_v31 = vadd.f32 1.0, %v1018_v30  ;;  %v1020_v32 = vpop.eup %1019 }
 0x15f   : > { %v1022_v33 = vpop.eup %1021  ;;  %v470_v38 = vmul.f32 %v1020_v32, %v400_v47 }
 0x160   : > { %1033 = vrcp.f32 %v452_v31  ;;  %v1024_v34 = vpop.eup %1023  ;;  %v453_v35 = vadd.f32 1.0, %v1022_v33 }
 0x161   : > { %v471_v43 = vmul.f32 %v1024_v34, %v1430_v49  ;;  %v1438_v45 = vadd.f32 %v470_v38, %v1355_v10 }
 0x162   : > { %v1026_v36 = vpop.eup %1025  ;;  %1035 = vrcp.f32 %v453_v35 }
 0x163   : > { %v1028_v37 = vpop.eup %1027  ;;  %v472_v39 = vmul.f32 %v1026_v36, %v406_v54  ;;  %v1449_v52 = vadd.f32 %v471_v43, %v1339_v2  ;;  %v506_v10 = vmul.f32 %v1438_v45, %v1438_v45 }
 0x164   : > { %v473_v40 = vmul.f32 %v1028_v37, %v408_v57 }
 0x165   : > { %v1434_v41 = vadd.f32 %v472_v39, %v1357_v11  ;;  %v507_v57 = vmul.f32 %v1449_v52, %v1449_v52 }
 0x166   : > { %v1030_v42 = vpop.eup %1029  ;;  %v1441_v48 = vadd.f32 %v473_v40, %v1341_v3 }
 0x167   : > { %v1032_v44 = vpop.eup %1031  ;;  %v474_v46 = vmul.f32 %v1030_v42, %v412_v61  ;;  %v508_v47 = vmul.f32 %v1434_v41, %v1434_v41  ;;  %v486_v3 = vadd.f32 %v1434_v41, %v1438_v45 }
 0x168   : > { %v475_v50 = vmul.f32 %v1032_v44, %v414_v63  ;;  %v495_v58 = vadd.f32 %v1441_v48, %v1449_v52 }
 0x169   : > { %v1446_v51 = vadd.f32 %v474_v46, %v1359_v12  ;;  %v509_v12 = vmul.f32 %v1441_v48, %v1441_v48  ;;  %v514_v56 = vadd.f32 %v508_v47, %v506_v10 }
 0x16a   : > { %v1034_v11 = vpop.eup %1033  ;;  %v1452_v49 = vadd.f32 %v475_v50, %v1343_v4 }
 0x16b   : > { %v510_v53 = vmul.f32 %v1446_v51, %v1446_v51  ;;  %v476_v54 = vmul.f32 %v1034_v11, %v418_v9  ;;  %v487_v2 = vadd.f32 %v486_v3, %v1446_v51  ;;  %v523_v1 = vadd.f32 %v509_v12, %v507_v57 }
 0x16c   : > { %v1036_v55 = vpop.eup %1035  ;;  %v511_v59 = vmul.f32 %v1452_v49, %v1452_v49 }
 0x16d   : > { %v1464_v4 = vadd.f32 %v476_v54, %v1361_v13  ;;  %v477_v60 = vmul.f32 %v1036_v55, %v420_v15  ;;  %v515_v61 = vadd.f32 %v514_v56, %v510_v53  ;;  %v496_v13 = vadd.f32 %v495_v58, %v1452_v49 }
 0x16e   : > { %v524_v9 = vadd.f32 %v523_v1, %v511_v59 }
 0x16f   : > { %v488_v62 = vadd.f32 %v487_v2, %v1464_v4  ;;  %v512_v63 = vmul.f32 %v1464_v4, %v1464_v4  ;;  %v1477_v6 = vadd.f32 %v477_v60, %v1345_v5 }
 0x171   : > { %v489_v7 = vrot.slane %v488_v62, 4  ;;  %v516_v8 = vadd.f32 %v515_v61, %v512_v63  ;;  %v497_v14 = vadd.f32 %v496_v13, %v1477_v6  ;;  %v513_v15 = vmul.f32 %v1477_v6, %v1477_v6 }
 0x173   : > { %v490_v16 = vadd.f32 %v489_v7, %v488_v62  ;;  %v517_v17 = vrot.slane %v516_v8, 4  ;;  %v498_v18 = vrot.slane %v497_v14, 4  ;;  %v525_v19 = vadd.f32 %v524_v9, %v513_v15 }
 0x175   : > { %v491_v20 = vrot.slane %v490_v16, 2  ;;  %v518_v21 = vadd.f32 %v517_v17, %v516_v8  ;;  %v499_v22 = vadd.f32 %v498_v18, %v497_v14  ;;  %v526_v23 = vrot.slane %v525_v19, 4 }
 0x177   : > { %v492_v24 = vadd.f32 %v491_v20, %v490_v16  ;;  %v519_v25 = vrot.slane %v518_v21, 2  ;;  %v500_v5 = vrot.slane %v499_v22, 2  ;;  %v527_v26 = vadd.f32 %v526_v23, %v525_v19  ;;  %v888_v19 = vld [vmem:[%s1575_s1 + $0x20] sm:$0xff]  ;;  %v889_v20 = vld [vmem:[%s1575_s1 + $0x28] sm:$0xff]  ;;  %v573_v23 = vpop.permute.xlu0 %572 }
 0x179   : > { %v493_v27 = vrot.slane %v492_v24, 1  ;;  %v520_v28 = vadd.f32 %v519_v25, %v518_v21  ;;  %v501_v29 = vadd.f32 %v500_v5, %v499_v22  ;;  %v528_v30 = vrot.slane %v527_v26, 2  ;;  %v890_v21 = vld [vmem:[%s1575_s1 + $0x30] sm:$0xff]  ;;  %v891_v22 = vld [vmem:[%s1575_s1 + $0x38] sm:$0xff] }
 0x17b   : > { %v521_v31 = vrot.slane %v520_v28, 1  ;;  %v494_v32 = vadd.f32 %v493_v27, %v492_v24  ;;  %v502_v33 = vrot.slane %v501_v29, 1  ;;  %v529_v34 = vadd.f32 %v528_v30, %v527_v26 }
 0x17d   : > { %v522_v35 = vadd.f32 %v521_v31, %v520_v28  ;;  %v504_v36 = vmul.f32 0.03125, %v494_v32  ;;  %v530_v37 = vrot.slane %v529_v34, 1  ;;  %v503_v38 = vadd.f32 %v502_v33, %v501_v29  ;;  %v578_v28 = vpop.permute.xlu1 %577 }
 0x17f   : > { %v532_v39 = vmul.f32 0.03125, %v522_v35  ;;  %v534_v40 = vmul.f32 %v504_v36, %v504_v36  ;;  %v531_v42 = vadd.f32 %v530_v37, %v529_v34  ;;  %v505_v43 = vmul.f32 0.03125, %v503_v38  ;;  %v583_v34 = vpop.permute.xlu0 %582 }
 0x180   : > { %v540_v12 = vsub.f32 %v1438_v45, %v504_v36  ;;  %v542_v55 = vsub.f32 %v1434_v41, %v504_v36  ;;  %v544_v7 = vsub.f32 %v1446_v51, %v504_v36  ;;  %v546_v8 = vsub.f32 %v1464_v4, %v504_v36 }
 0x181   : > { %v536_v44 = vsub.f32 %v532_v39, %v534_v40  ;;  %v533_v46 = vmul.f32 0.03125, %v531_v42  ;;  %v535_v50 = vmul.f32 %v505_v43, %v505_v43  ;;  %v541_v56 = vsub.f32 %v1449_v52, %v505_v43  ;;  %v588_v42 = vpop.permute.xlu1 %587 }
 0x182   : > { %v543_v2 = vsub.f32 %v1441_v48, %v505_v43  ;;  %v545_v57 = vsub.f32 %v1452_v49, %v505_v43  ;;  %v547_v58 = vsub.f32 %v1477_v6, %v505_v43 }
 0x183   : > { %v538_v47 = vmax.f32 %v536_v44, 0.0  ;;  %v537_v11 = vsub.f32 %v533_v46, %v535_v50 }
 0x185   : > { %v548_v10 = vadd.f32 1e-05, %v538_v47  ;;  %v539_v3 = vmax.f32 %v537_v11, 0.0 }
 0x187   : > { %1037 = vrsqrt.f32 %v548_v10  ;;  %v549_v53 = vadd.f32 1e-05, %v539_v3 }
 0x189   : > { %1039 = vrsqrt.f32 %v549_v53 }
 0x191   : > { %v1038_v54 = vpop.eup %1037 }
 0x192   : > { %v552_v60 = vmul.f32 %v1038_v54, %v540_v12  ;;  %v554_v61 = vmul.f32 %v1038_v54, %v542_v55  ;;  %v556_v15 = vmul.f32 %v1038_v54, %v544_v7  ;;  %v558_v16 = vmul.f32 %v1038_v54, %v546_v8 }
 0x193   : > { %v1040_v59 = vpop.eup %1039 }
 0x194   : > { %v553_v62 = vmul.f32 %v1040_v59, %v541_v56  ;;  %v555_v63 = vmul.f32 %v1040_v59, %v543_v2  ;;  %v557_v1 = vmul.f32 %v1040_v59, %v545_v57  ;;  %v559_v13 = vmul.f32 %v1040_v59, %v547_v58 }
 0x195   : > { %v925_v14 = vpack.c.bf16 %v554_v61, %v552_v60  ;;  %v929_v18 = vpack.c.bf16 %v558_v16, %v556_v15 }
 0x196   : > { %v923_v9 = vpack.c.bf16 %v555_v63, %v553_v62  ;;  %v927_v17 = vpack.c.bf16 %v559_v13, %v557_v1 }
 0x198   : > { %924 = vmatprep.subr.bf16.mxu1 %v923_v9 }
 0x199   : > { %926 = vmatpush1.bf16.msra.mxu1 %v925_v14 }
 0x19a   : > { %928 = vmatprep.subr.bf16.mxu1 %v927_v17 }
 0x19d   : > { %930 = vmatpush1.bf16.msra.mxu1 %v929_v18 }
 0x1a0   : > { %896 = vmatmul.mubr.msk.f32.vlgmr.msra.gmra.mrb[0].mxu1 %vm320_vm0, %v888_v19 }
 0x1a1   : > { %672 = vmatprep.mubr.f32.mxu1 %v1190_v0 }
 0x1a4   : > { %897 = vmatmul.mubr.msk.f32.gmra.mrb[2].mxu1 %vm320_vm0, %v889_v20 }
 0x1a5   : > { %678 = vmatprep.mubr.f32.mxu1 %v1190_v0 }
 0x1a8   : > { %898 = vmatmul.mubr.msk.f32.gmra.mrb[4].mxu1 %vm320_vm0, %v890_v21 }
 0x1a9   : > { %684 = vmatprep.mubr.f32.mxu1 %v1190_v0 }
 0x1ac   : > { %899 = vmatmul.mubr.msk.f32.gmra.mrb[6].mxu1 %vm320_vm0, %v891_v22 }
 0x273   : > { %v668_v24 = vpop.f32.mrb[0].mxu1 }
 0x274   : > { %v669_v25 = vadd.f32 %v668_v24, %v573_v23  ;;  %v670_v5 = vpop.f32.mrb[1].mxu1 }
 0x275   : > { %v671_v26 = vadd.f32 %v670_v5, %v573_v23 }
 0x276   : > { %v900_v27 = vmul.f32 -1.442695, %v669_v25 }
 0x277   : > { %v901_v29 = vmul.f32 -1.442695, %v671_v26  ;;  %v674_v30 = vpop.f32.mrb[2].mxu1 }
 0x278   : > { %1041 = vpow2.f32 %v900_v27  ;;  %v675_v31 = vadd.f32 %v674_v30, %v578_v28  ;;  %v676_v32 = vpop.f32.mrb[3].mxu1 }
 0x279   : > { %1043 = vpow2.f32 %v901_v29  ;;  %v677_v0 = vadd.f32 %v676_v32, %v578_v28 }
 0x27a   : > { %v902_v33 = vmul.f32 -1.442695, %v675_v31 }
 0x27b   : > { %v903_v35 = vmul.f32 -1.442695, %v677_v0  ;;  %v680_v36 = vpop.f32.mrb[4].mxu1 }
 0x27c   : > { %1045 = vpow2.f32 %v902_v33  ;;  %v681_v37 = vadd.f32 %v680_v36, %v583_v34  ;;  %v682_v38 = vpop.f32.mrb[5].mxu1 }
 0x27d   : > { %1047 = vpow2.f32 %v903_v35  ;;  %v683_v39 = vadd.f32 %v682_v38, %v583_v34 }
 0x27e   : > { %v904_v40 = vmul.f32 -1.442695, %v681_v37 }
 0x27f   : > { %v905_v43 = vmul.f32 -1.442695, %v683_v39  ;;  %v686_v44 = vpop.f32.mrb[6].mxu1 }
 0x280   : > { %1049 = vpow2.f32 %v904_v40  ;;  %v687_v46 = vadd.f32 %v686_v44, %v588_v42  ;;  %v688_v50 = vpop.f32.mrb[7].mxu1 }
 0x281   : > { %1051 = vpow2.f32 %v905_v43  ;;  %v689_v47 = vadd.f32 %v688_v50, %v588_v42 }
 0x282   : > { %v1042_v11 = vpop.eup %1041  ;;  %v906_v10 = vmul.f32 -1.442695, %v687_v46 }
 0x283   : > { %v1044_v3 = vpop.eup %1043  ;;  %v715_v53 = vadd.f32 1.0, %v1042_v11  ;;  %v907_v54 = vmul.f32 -1.442695, %v689_v47 }
 0x284   : > { %v716_v12 = vadd.f32 1.0, %v1044_v3  ;;  %1053 = vpow2.f32 %v906_v10 }
 0x285   : > { %1055 = vrcp.f32 %v715_v53 }
 0x286   : > { %v1046_v55 = vpop.eup %1045  ;;  %1057 = vrcp.f32 %v716_v12 }
 0x287   : > { %v1048_v56 = vpop.eup %1047  ;;  %v717_v2 = vadd.f32 1.0, %v1046_v55  ;;  %1059 = vpow2.f32 %v907_v54 }
 0x288   : > { %v718_v57 = vadd.f32 1.0, %v1048_v56 }
 0x289   : > { %1061 = vrcp.f32 %v717_v2 }
 0x28a   : > { %v1050_v58 = vpop.eup %1049  ;;  %1063 = vrcp.f32 %v718_v57 }
 0x28b   : > { %v1052_v59 = vpop.eup %1051  ;;  %v719_v60 = vadd.f32 1.0, %v1050_v58 }
 0x28c   : > { %v720_v61 = vadd.f32 1.0, %v1052_v59 }
 0x28d   : > { %1065 = vrcp.f32 %v719_v60 }
 0x28e   : > { %v1054_v62 = vpop.eup %1053  ;;  %1067 = vrcp.f32 %v720_v61 }
 0x28f   : > { %v1056_v63 = vpop.eup %1055  ;;  %v721_v1 = vadd.f32 1.0, %v1054_v62 }
 0x290   : > { %v1058_v13 = vpop.eup %1057  ;;  %v739_v7 = vmul.f32 %v1056_v63, %v669_v25 }
 0x291   : > { %v1060_v8 = vpop.eup %1059  ;;  %v740_v9 = vmul.f32 %v1058_v13, %v671_v26  ;;  %1069 = vrcp.f32 %v721_v1 }
 0x292   : > { %v747_v14 = vadd.f32 %v739_v7, %v1438_v45  ;;  %v722_v15 = vadd.f32 1.0, %v1060_v8 }
 0x293   : > { %v1062_v16 = vpop.eup %1061  ;;  %v748_v17 = vadd.f32 %v740_v9, %v1449_v52 }
 0x294   : > { %v1064_v18 = vpop.eup %1063  ;;  %755 = vst [vmem:[%s206_s8] sm:$0xff] %v747_v14  ;;  %v741_v19 = vmul.f32 %v1062_v16, %v675_v31  ;;  %1071 = vrcp.f32 %v722_v15 }
 0x295   : > { %756 = vst [vmem:[%s206_s8 + $0x8] sm:$0xff] %v748_v17  ;;  %v742_v20 = vmul.f32 %v1064_v18, %v677_v0 }
 0x296   : > { %v749_v21 = vadd.f32 %v741_v19, %v1434_v41 }
 0x297   : > { %v1066_v22 = vpop.eup %1065  ;;  %v750_v23 = vadd.f32 %v742_v20, %v1441_v48 }
 0x298   : > { %v1068_v24 = vpop.eup %1067  ;;  %757 = vst [vmem:[%s206_s8 + $0x10] sm:$0xff] %v749_v21  ;;  %v743_v45 = vmul.f32 %v1066_v22, %v681_v37 }
 0x299   : > { %758 = vst [vmem:[%s206_s8 + $0x18] sm:$0xff] %v750_v23  ;;  %v744_v25 = vmul.f32 %v1068_v24, %v683_v39 }
 0x29a   : > { %v751_v52 = vadd.f32 %v743_v45, %v1446_v51 }
 0x29b   : > { %v1070_v5 = vpop.eup %1069  ;;  %v752_v26 = vadd.f32 %v744_v25, %v1452_v49 }
 0x29c   : > { %759 = vst [vmem:[%s206_s8 + $0x20] sm:$0xff] %v751_v52  ;;  %v745_v27 = vmul.f32 %v1070_v5, %v687_v46 }
 0x29d   : > { %760 = vst [vmem:[%s206_s8 + $0x28] sm:$0xff] %v752_v26 }
 0x29e   : > { %v1072_v41 = vpop.eup %1071  ;;  %v753_v48 = vadd.f32 %v745_v27, %v1464_v4 }
 0x29f   : > { %v746_v28 = vmul.f32 %v1072_v41, %v689_v47 }
 0x2a0   : > { %761 = vst [vmem:[%s206_s8 + $0x30] sm:$0xff] %v753_v48 }
 0x2a1   : > { %v754_v51 = vadd.f32 %v746_v28, %v1477_v6 }
 0x2a3   : > { %762 = vst [vmem:[%s206_s8 + $0x38] sm:$0xff] %v754_v51 }
 0x2a4   : > { %1116 = shalt.err (!%p1113_p5)
}
 0x2a5   : > { %s1117_s5 = scalar_lea.hbm %s1522_s23, 1024  ;;  %s1121_s21 = scalar_lea.hbm %s1577_s3, 2048 }
 0x2a6   : > { %p1118_p4 = scmp.ne.s32.totalorder %s1522_s23, %s1117_s5  ;;  %p1122_p12 = scmp.lt.u32.totalorder %s1522_s23, %s1577_s3 }
 0x2a7   : > { %p1123_p1 = scmp.lt.u32.totalorder %s1121_s21, %s1117_s5  ;;  %p1125_p8 = scmp.lt.u32.totalorder %s1117_s5, %s1522_s23 }
 0x2a8   : > { %p1119_p7 = pnand %p1118_p4, %p1585_p9 }
 0x2a9   : > { %p1124_p3 = por %p1123_p1, %p1122_p12 }
 0x2aa   : > { %p1120_p10 = pneg %p1119_p7 }
 0x2ab   : > { %p1126_p11 = por %p1125_p8, %p1124_p3 }
 0x2ad   : > { %p1127_p0 = pnand %p1126_p11, %p1120_p10 }
 0x2af   : > { %1130 = shalt.err (!%p1127_p0)
}
 0x2b0   : > { %s1193_s8 = smov 256   ;;  %s1194_s18 = smov 16  }
 0x2b1   : > { %933 = dma.vmem_to_hbm [thread:$0]  (%p1585_p9), %s1524_s9, 1024, %s1522_s23, %s764_s15, %s1193_s8, %s1193_s8, %s1194_s18  }
 0x2b2 PF: > { %s794_s10 = sand.u32 1, %s1165_s12   ;;  %p1586_p6 = scmp.ne.s32.totalorder %s1582_s27, 0 }
 0x2b3   : > { %p1587_p13 = scmp.ge.s32.totalorder %s1185_s17, 2  ;;  %s795_s22 = scalar_lea.sflag [#allocation4], %s794_s10 }
 0x2b5   : > { %p940_p2 = pnand %p1587_p13, %p1586_p6 }
 0x2b7   : > { %1160 = dma.done.wait (!%p940_p2), %s795_s22, 1024  }
 0x2b8   : > { %1162 = vsyncadd (!%p940_p2), %s795_s22, 4294966272  ;;  %s19_s17 = sadd.s32 1, %s1185_s17   ;;  %s1588_s12 = smov %s1169_s13 }
 0x2b9   : > { %p16_p5 = scmp.ge.s32.totalorder %s19_s17, 4   ;;  %s1589_s13 = smov %s1173_s14 }
 0x2ba   : > { %s1590_s14 = smov %s1271_s26  ;;  %s1591_s15 = smov %s1181_s16 }
 0x2bb   : > { %s1592_s16 = smov %s1594_s20  ;;  %18 = sbr.rel (!%p16_p5) target bundleno = 6 (0x6), region = 79 }
 0x2c2   :  { %800 = vsyncpa [#allocation3], 1 }
 0x2c3   :  { %802 = vsyncpa [#allocation3 + $0x1], 1 }
 0x2c4   :  { %803 = vsyncpa [#allocation4], 1 }
 0x2c5   :  { %805 = vsyncpa [#allocation4 + $0x1], 1 }

</bundles_post_ra>
